<compile_context>
chip_gen: v5e
topology: v5e:2x2
jax: 0.10.0
libtpu: 0.0.40
codegen_flags: <defaults>
</compile_context>

<pallas_src>
import functools

import jax
import jax.numpy as jnp
import numpy as np
from jax import lax
from jax.experimental import pallas as pl
from jax.experimental.pallas import tpu as pltpu


def _gradient_loss_kernel(x_ref, o_ref, *, penalty, d, h, w, rows,
                          w_d, w_h, w_w):
    """x_ref: (1, rows, h*w) block with rows = nc_tile*d; o_ref: (1, 1, h*w)."""
    hw = h * w
    x = x_ref[0]                                                 # (rows, hw)

    # Rank-1 weighted masks; weights already fold mean denominators, /3 and
    # loss_mult.  Lane-only masks are hoisted past the sublane reduce.
    lane = lax.broadcasted_iota(jnp.int32, (1, hw), 1)
    row = lax.broadcasted_iota(jnp.int32, (rows, 1), 0)
    wmask_w = jnp.where((lane % w) != (w - 1), jnp.float32(w_w), jnp.float32(0.0))
    wmask_h = jnp.where(lane < (h - 1) * w, jnp.float32(w_h), jnp.float32(0.0))
    wmask_d = jnp.where((row % d) != (d - 1), jnp.float32(w_d), jnp.float32(0.0))

    def val(shift, axis):
        diff = (x - pltpu.roll(x, shift, axis=axis)).astype(jnp.float32)
        return diff * diff if penalty == 'l2' else jnp.abs(diff)

    # W neighbor: next lane element (roll by -1 == hw - 1).  Reduce rows, then
    # apply the weighted lane mask to the tiny (1, hw) partial.
    pw = jnp.sum(val(hw - 1, 1), axis=0, keepdims=True) * wmask_w
    # H neighbor: element w lanes ahead (roll by -w == hw - w).
    ph = jnp.sum(val(hw - w, 1), axis=0, keepdims=True) * wmask_h
    # D neighbor: next row of the flattened (slab, depth) axis.  Rows that
    # cross a slab (or the block wrap) are exactly the (row % d == d-1) rows
    # and are zeroed by the weighted row mask before the reduce.
    pd = jnp.sum(val(rows - 1, 0) * wmask_d, axis=0, keepdims=True)

    o_ref[...] = (pw + ph + pd)[None]                            # (1, 1, hw)


def gradient_loss(displacement_vector_field, penalty='l2', loss_mult=None):
    """Pallas TPU implementation of GradientLoss.forward."""
    n, c, d, h, w = displacement_vector_field.shape
    nc = n * c
    hw = h * w
    mult = 1.0 if loss_mult is None else float(loss_mult)

    if d < 2 or h < 2 or w < 2:
        # PyTorch reference: mean over an empty tensor yields NaN.
        return jnp.float32(jnp.nan)

    x = displacement_vector_field.reshape(nc, d, hw)
    itemsize = x.dtype.itemsize

    # Per-term weights fold in the mean denominators, the /3 and loss_mult.
    w_d = mult / (3.0 * nc * (d - 1) * h * w)
    w_h = mult / (3.0 * nc * d * (h - 1) * w)
    w_w = mult / (3.0 * nc * d * h * (w - 1))

    # Generation-aware block sizing.  Peak VMEM ~= 2*block (double-buffered
    # input) + ~2*block of f32 temporaries, so keep ~4*block under the limit.
    try:
        vmem_cap = pltpu.get_tpu_info().vmem_capacity_bytes
    except Exception:                                        # pragma: no cover
        vmem_cap = 64 * 1024 * 1024                          # conservative
    if vmem_cap >= 96 * 1024 * 1024:       # v5e / v6e: 128 MiB VMEM
        target_block_bytes = 16 * 1024 * 1024
        vmem_limit = 96 * 1024 * 1024
    else:                                   # v7x: 64 MiB VMEM per TC
        target_block_bytes = 8 * 1024 * 1024
        vmem_limit = 48 * 1024 * 1024

    slab_bytes = d * hw * itemsize
    nc_tile = int(max(1, min(nc, target_block_bytes // max(slab_bytes, 1))))
    # Guarantee >= 2 grid steps whenever NC >= 2 so the "parallel" axis feeds
    # both v7x TensorCores (no effect on single-TC v5e/v6e).
    if nc >= 2:
        nc_tile = min(nc_tile, -(-nc // 2))
    g = -(-nc // nc_tile)                   # ceil-div
    pad = g * nc_tile - nc
    if pad:
        # Zero-padded slabs contribute exactly 0 to every term.
        x = jnp.pad(x, ((0, pad), (0, 0), (0, 0)))
    rows = nc_tile * d
    x = x.reshape(g, rows, hw)

    kernel = functools.partial(
        _gradient_loss_kernel, penalty=penalty, d=d, h=h, w=w, rows=rows,
        w_d=w_d, w_h=w_h, w_w=w_w)

    cost = pl.CostEstimate(
        flops=10 * g * rows * hw,
        transcendentals=0,
        bytes_accessed=g * rows * hw * itemsize + g * hw * 4,
    )

    partials = pl.pallas_call(
        kernel,
        out_shape=jax.ShapeDtypeStruct((g, 1, hw), jnp.float32),
        grid=(g,),
        in_specs=[pl.BlockSpec((1, rows, hw), lambda i: (i, 0, 0))],
        out_specs=pl.BlockSpec((1, 1, hw), lambda i: (i, 0, 0)),
        compiler_params=pltpu.CompilerParams(
            dimension_semantics=("parallel",),
            vmem_limit_bytes=vmem_limit),
        cost_estimate=cost,
    )(x)

    # Tiny lane-dense partials; final reduction in the wrapper (keeps the grid
    # axis embarrassingly parallel).
    return jnp.sum(partials)


def gradient_loss_ref(dvf, penalty='l2', loss_mult=None):
    """Pure-JAX reference mirroring the PyTorch forward, for validation."""
    dy = jnp.abs(dvf[:, :, 1:, :, :] - dvf[:, :, :-1, :, :])
    dx = jnp.abs(dvf[:, :, :, 1:, :] - dvf[:, :, :, :-1, :])
    dz = jnp.abs(dvf[:, :, :, :, 1:] - dvf[:, :, :, :, :-1])
    if penalty == 'l2':
        dy, dx, dz = dy * dy, dx * dx, dz * dz
    grad = (jnp.mean(dx) + jnp.mean(dy) + jnp.mean(dz)) / 3.0
    if loss_mult is not None:
        grad = grad * loss_mult
    return grad


if __name__ == "__main__":
    key = jax.random.PRNGKey(0)
    # Small 3-D displacement vector field: [N, C, D, H, W]
    x = jax.random.normal(key, (2, 3, 8, 16, 16), dtype=jnp.float32)

    # l2 penalty, no multiplier.
    out_l2 = jax.block_until_ready(gradient_loss(x, penalty='l2'))
    ref_l2 = gradient_loss_ref(x, penalty='l2')
    assert np.allclose(np.asarray(out_l2), np.asarray(ref_l2),
                       rtol=1e-4, atol=1e-6), (float(out_l2), float(ref_l2))

    # l1 penalty with a loss multiplier.
    out_l1 = jax.block_until_ready(gradient_loss(x, penalty='l1',
                                                 loss_mult=0.5))
    ref_l1 = gradient_loss_ref(x, penalty='l1', loss_mult=0.5)
    assert np.allclose(np.asarray(out_l1), np.asarray(ref_l1),
                       rtol=1e-4, atol=1e-6), (float(out_l1), float(ref_l1))

    print("KERNEL_OK")
</pallas_src>

<mosaic_0001>
module attributes {stable_mosaic.version = 11 : i64} {
  func.func @_gradient_loss_kernel(%arg0: i32, %arg1: memref<1x24x256xf32, #tpu.memory_space<vmem>>, %arg2: memref<1x1x256xf32, #tpu.memory_space<vmem>>) attributes {dimension_semantics = [#tpu.dimension_semantics<parallel>], iteration_bounds = array<i64: 2>, scalar_prefetch = 0 : i64, scratch_operands = 0 : i64, tpu.core_type = #tpu.core_type<tc>, window_params = [{transform_indices = @transform_0, window_bounds = array<i64: 1, 24, 256>}, {transform_indices = @transform_1, window_bounds = array<i64: 1, 1, 256>}]} {
    %c0 = arith.constant 0 : index
    %c0_0 = arith.constant 0 : index
    %c0_1 = arith.constant 0 : index
    %0 = vector.load %arg1[%c0, %c0_0, %c0_1] : memref<1x24x256xf32, #tpu.memory_space<vmem>>, vector<1x24x256xf32>
    %1 = vector.shape_cast %0 : vector<1x24x256xf32> to vector<24x256xf32>
    %2 = tpu.iota {dimensions = array<i32: 1>} : vector<1x256xi32>
    %3 = tpu.iota {dimensions = array<i32: 0>} : vector<24x1xi32>
    %c16_i32 = arith.constant 16 : i32
    %c0_i32 = arith.constant 0 : i32
    %4 = arith.cmpi eq, %c16_i32, %c0_i32 : i32
    %c1_i32 = arith.constant 1 : i32
    %5 = arith.select %4, %c1_i32, %c16_i32 : i32
    %6 = vector.broadcast %5 : i32 to vector<1x256xi32>
    %7 = arith.remsi %2, %6 : vector<1x256xi32>
    %c0_i32_2 = arith.constant 0 : i32
    %8 = vector.broadcast %c0_i32_2 : i32 to vector<1x256xi32>
    %9 = arith.cmpi ne, %7, %8 : vector<1x256xi32>
    %c0_i32_3 = arith.constant 0 : i32
    %10 = vector.broadcast %c0_i32_3 : i32 to vector<1x256xi32>
    %11 = arith.cmpi slt, %7, %10 : vector<1x256xi32>
    %c0_i32_4 = arith.constant 0 : i32
    %12 = arith.cmpi slt, %5, %c0_i32_4 : i32
    %13 = vector.broadcast %12 : i1 to vector<1x256xi1>
    %14 = vector.broadcast %13 : vector<1x256xi1> to vector<1x256xi1>
    %15 = arith.xori %11, %14 : vector<1x256xi1>
    %16 = arith.andi %15, %9 : vector<1x256xi1>
    %17 = vector.broadcast %5 : i32 to vector<1x256xi32>
    %18 = arith.addi %7, %17 : vector<1x256xi32>
    %19 = arith.select %16, %18, %7 : vector<1x256xi1>, vector<1x256xi32>
    %c15_i32 = arith.constant 15 : i32
    %20 = vector.broadcast %c15_i32 : i32 to vector<1x256xi32>
    %21 = arith.cmpi ne, %19, %20 : vector<1x256xi32>
    %cst = arith.constant 2.89351847E-5 : f32
    %cst_5 = arith.constant 0.000000e+00 : f32
    %22 = vector.broadcast %cst : f32 to vector<1x256xf32>
    %23 = vector.broadcast %cst_5 : f32 to vector<1x256xf32>
    %24 = arith.select %21, %22, %23 : vector<1x256xi1>, vector<1x256xf32>
    %c240_i32 = arith.constant 240 : i32
    %25 = vector.broadcast %c240_i32 : i32 to vector<1x256xi32>
    %26 = arith.cmpi slt, %2, %25 : vector<1x256xi32>
    %cst_6 = arith.constant 2.89351847E-5 : f32
    %cst_7 = arith.constant 0.000000e+00 : f32
    %27 = vector.broadcast %cst_6 : f32 to vector<1x256xf32>
    %28 = vector.broadcast %cst_7 : f32 to vector<1x256xf32>
    %29 = arith.select %26, %27, %28 : vector<1x256xi1>, vector<1x256xf32>
    %c8_i32 = arith.constant 8 : i32
    %c0_i32_8 = arith.constant 0 : i32
    %30 = arith.cmpi eq, %c8_i32, %c0_i32_8 : i32
    %c1_i32_9 = arith.constant 1 : i32
    %31 = arith.select %30, %c1_i32_9, %c8_i32 : i32
    %32 = vector.broadcast %31 : i32 to vector<24x1xi32>
    %33 = arith.remsi %3, %32 : vector<24x1xi32>
    %c0_i32_10 = arith.constant 0 : i32
    %34 = vector.broadcast %c0_i32_10 : i32 to vector<24x1xi32>
    %35 = arith.cmpi ne, %33, %34 : vector<24x1xi32>
    %c0_i32_11 = arith.constant 0 : i32
    %36 = vector.broadcast %c0_i32_11 : i32 to vector<24x1xi32>
    %37 = arith.cmpi slt, %33, %36 : vector<24x1xi32>
    %c0_i32_12 = arith.constant 0 : i32
    %38 = arith.cmpi slt, %31, %c0_i32_12 : i32
    %39 = vector.broadcast %38 : i1 to vector<24x1xi1>
    %40 = vector.broadcast %39 : vector<24x1xi1> to vector<24x1xi1>
    %41 = arith.xori %37, %40 : vector<24x1xi1>
    %42 = arith.andi %41, %35 : vector<24x1xi1>
    %43 = vector.broadcast %31 : i32 to vector<24x1xi32>
    %44 = arith.addi %33, %43 : vector<24x1xi32>
    %45 = arith.select %42, %44, %33 : vector<24x1xi1>, vector<24x1xi32>
    %c7_i32 = arith.constant 7 : i32
    %46 = vector.broadcast %c7_i32 : i32 to vector<24x1xi32>
    %47 = arith.cmpi ne, %45, %46 : vector<24x1xi32>
    %cst_13 = arith.constant 3.10019859E-5 : f32
    %cst_14 = arith.constant 0.000000e+00 : f32
    %48 = vector.broadcast %cst_13 : f32 to vector<24x1xf32>
    %49 = vector.broadcast %cst_14 : f32 to vector<24x1xf32>
    %50 = arith.select %47, %48, %49 : vector<24x1xi1>, vector<24x1xf32>
    %c255_i32 = arith.constant 255 : i32
    %51 = tpu.dynamic_rotate %1 by %c255_i32 dim 1 : vector<24x256xf32>, i32 -> vector<24x256xf32>
    %52 = arith.subf %1, %51 : vector<24x256xf32>
    %53 = arith.mulf %52, %52 : vector<24x256xf32>
    %cst_15 = arith.constant dense<0.000000e+00> : vector<256xf32>
    %54 = vector.multi_reduction <add>, %53, %cst_15 [0] : vector<24x256xf32> to vector<256xf32>
    %55 = vector.shape_cast %54 : vector<256xf32> to vector<1x256xf32>
    %56 = arith.mulf %55, %24 : vector<1x256xf32>
    %c240_i32_16 = arith.constant 240 : i32
    %57 = tpu.dynamic_rotate %1 by %c240_i32_16 dim 1 : vector<24x256xf32>, i32 -> vector<24x256xf32>
    %58 = arith.subf %1, %57 : vector<24x256xf32>
    %59 = arith.mulf %58, %58 : vector<24x256xf32>
    %cst_17 = arith.constant dense<0.000000e+00> : vector<256xf32>
    %60 = vector.multi_reduction <add>, %59, %cst_17 [0] : vector<24x256xf32> to vector<256xf32>
    %61 = vector.shape_cast %60 : vector<256xf32> to vector<1x256xf32>
    %62 = arith.mulf %61, %29 : vector<1x256xf32>
    %c23_i32 = arith.constant 23 : i32
    %63 = tpu.dynamic_rotate %1 by %c23_i32 dim 0 : vector<24x256xf32>, i32 -> vector<24x256xf32>
    %64 = arith.subf %1, %63 : vector<24x256xf32>
    %65 = arith.mulf %64, %64 : vector<24x256xf32>
    %66 = vector.broadcast %50 : vector<24x1xf32> to vector<24x256xf32>
    %67 = arith.mulf %65, %66 : vector<24x256xf32>
    %cst_18 = arith.constant dense<0.000000e+00> : vector<256xf32>
    %68 = vector.multi_reduction <add>, %67, %cst_18 [0] : vector<24x256xf32> to vector<256xf32>
    %69 = vector.shape_cast %68 : vector<256xf32> to vector<1x256xf32>
    %70 = arith.addf %56, %62 : vector<1x256xf32>
    %71 = arith.addf %70, %69 : vector<1x256xf32>
    %72 = vector.shape_cast %71 : vector<1x256xf32> to vector<1x1x256xf32>
    %c0_19 = arith.constant 0 : index
    %c0_20 = arith.constant 0 : index
    %c0_21 = arith.constant 0 : index
    %73 = vector.load %arg2[%c0_19, %c0_20, %c0_21] : memref<1x1x256xf32, #tpu.memory_space<vmem>>, vector<1x1x256xf32>
    tpu.vector_store %arg2[%c0_19, %c0_20, %c0_21], %72 {strides = array<i32>} : memref<1x1x256xf32, #tpu.memory_space<vmem>>, vector<1x1x256xf32>,
    return
  }
  func.func @transform_0(%arg0: i32) -> (i32, i32, i32) {
    %c0_i32 = arith.constant 0 : i32
    %c0_i32_0 = arith.constant 0 : i32
    %c0_i32_1 = arith.constant 0 : i32
    return %arg0, %c0_i32, %c0_i32_0 : i32, i32, i32
  }
  func.func @transform_1(%arg0: i32) -> (i32, i32, i32) {
    %c0_i32 = arith.constant 0 : i32
    %c0_i32_0 = arith.constant 0 : i32
    %c0_i32_1 = arith.constant 0 : i32
    return %arg0, %c0_i32, %c0_i32_0 : i32, i32, i32
  }
}

</mosaic_0001>

<bundles_post_ra>
// kernel: tpu_custom_call.1
= control target key start
LH: loop header
LB: loop body
LE: loop exit
PB: predicated region body
PF: predicated region fallthrough
CT: control target
= control target key end

     0   :  { %6 = vsyncpa [#allocation3], 0  ;;  %s862_s0 = inlined_call_operand.hbm [shape: f32[2,24,256], index: 0, kind: input, shape index: {}]   ;;  %s863_s1 = inlined_call_operand.hbm [shape: f32[2,1,256], index: 1, kind: output, shape index: {}]  }
   0x1   :  { %8 = vsyncpa [#allocation3 + $0x1], 0 }
   0x2   :  { %9 = vsyncpa [#allocation4], 0 }
   0x3   :  { %11 = vsyncpa [#allocation4 + $0x1], 0  ;;  %s647_s6 = smov 0   ;;  %s649_s7 = smov 0  }
   0x4   :  { %s651_s8 = smov 0   ;;  %s653_s9 = smov 0  }
   0x5 LB: > { %s668_s10 = sadd.s32 4294967295, %s630_s9   ;;  %s470_s11 = sadd.s32 4294967294, %s630_s9   ;;  %s630_s9 = sphi %s653_s9, %s871_s9   ;;  %s626_s8 = sphi %s651_s8, %s870_s8   ;;  %s622_s7 = sphi %s649_s7, %s869_s7   ;;  %s618_s6 = sphi %s647_s6, %s868_s6  }
   0x6   : > { %s672_s12 = sadd.s32 1, %s630_s9   ;;  %s24_s13 = sadd.s32 1, %s626_s8 }
   0x7   : > { %s21_s14 = ssub.s32 %s630_s9, %s672_s12  ;;  %p31_p0 = scmp.ne.s32.totalorder %s626_s8, %s622_s7 }
   0x8   : > { %p22_p1 = scmp.eq.s32.totalorder %s21_s14, 0  ;;  %p32_p2 = scmp.eq.s32.totalorder %s630_s9, 0 }
   0x9   : > { %p37_p3 = scmp.ne.s32.totalorder %s622_s7, %s618_s6  ;;  %p38_p4 = scmp.eq.s32.totalorder %s668_s10, 0 }
   0xa   : > { %s684_s15 = scalar_select %p22_p1, %s626_s8, %s24_s13  }
   0xb   : > { %p33_p5 = por %p32_p2, %p31_p0  ;;  %p686_p6 = por %p38_p4, %p37_p3 }
   0xc   : > { %p61_p7 = scmp.eq.s32.totalorder %s668_s10, 1  ;;  %p67_p8 = scmp.eq.s32.totalorder %s470_s11, 1 }
   0xd   : > { %p472_p9 = scmp.ge.s32.totalorder %s630_s9, 2  ;;  %p495_p10 = scmp.lt.s32.totalorder %s630_s9, 2 }
   0xe   : > { %p693_p11 = por %p61_p7, %p31_p0  ;;  %p697_p12 = por %p67_p8, %p37_p3 }
   0xf   : > { %s87_s19 = sand.u32 1, %s626_s8   ;;  %s481_s20 = smul.u32 48, %s630_s9 }
  0x10   : > { %s480_s21 = smul.u32 48, %s87_s19  ;;  %p706_p13 = pnand %p495_p10, %p33_p5 }
  0x11   : > { %s96_s24 = scalar_lea.hbm %s862_s0, %s481_s20  ;;  %s88_s29 = scalar_lea.sflag [#allocation3], %s87_s19 }
  0x12   : > { %s97_s26 = sshll.u32 %s96_s24, 4  ;;  %s91_s27 = scalar_lea.vmem [#allocation2], %s480_s21  ;;  %s98_s26 = int_to_ptr.hbm [resolvable:$true] %s97_s26 }
  0x13   : > { %s99_s28 = sshll.u32 %s91_s27, 4  ;;  %s534_s30 = sshra.s32 %s98_s26, 4  ;;  %s100_s28 = int_to_ptr.vmem [resolvable:$true] %s99_s28  ;;  %s535_s30 = int_to_ptr.hbm [resolvable:$true] %s534_s30 }
  0x14   : > { %s536_s2 = scalar_lea.hbm %s535_s30, 48  ;;  %p538_p1 = pneg %p706_p13 }
  0x15   : > { %p537_p0 = scmp.ne.s32.totalorder %s535_s30, %s536_s2  ;;  %s541_s5 = scalar_lea.hbm %s862_s0, 96 }
  0x16   : > { %p542_p4 = scmp.lt.s32.totalorder %s535_s30, %s862_s0  ;;  %p543_p5 = scmp.lt.s32.totalorder %s541_s5, %s536_s2 }
  0x17   : > { %p539_p2 = pnand %p538_p1, %p537_p0 }
  0x18   : > { %p544_p7 = por %p543_p5, %p542_p4 }
  0x19   : > { %p540_p3 = pneg %p539_p2 }
  0x1b   : > { %p545_p8 = pnand %p544_p7, %p540_p3 }
  0x1d   : > { %548 = shalt.err (!%p545_p8)
}
  0x1e   : > { %s632_s14 = smov 256   ;;  %s633_s19 = smov 16  }
  0x1f   : > { %490 = dma.hbm_to_vmem [thread:$0]  (!%p706_p13), %s98_s26, 768, %s100_s28, %s88_s29, %s632_s14, %s632_s14, %s633_s19  }
  0x20   : > { %p474_p10 = scmp.ge.s32.totalorder %s630_s9, 1  ;;  %p107_p0 = scmp.lt.s32.totalorder %s630_s9, 3 }
  0x22   : > { %p108_p1 = pnand %p474_p10, %p107_p0 }
  0x23   : > { %s723_s20 = sand.u32 (!%p108_p1), 1, %s622_s7  }
  0x24   : > { %111 = sbr.rel (%p108_p1) target bundleno = 213 (0xd5), region = 24  ;;  %s114_s22 = scalar_lea.sflag (!%p108_p1), [#allocation3], %s723_s20 }
  0x25   : > { %s482_s21 = smul.u32 (!%p108_p1), 48, %s723_s20 }
  0x27   : > { %s117_s23 = scalar_lea.vmem (!%p108_p1), [#allocation2], %s482_s21 }
  0x29   : > { %609 = dma.done.wait (%p686_p6), %s114_s22, 768  }
  0x2a   : > { %611 = vsyncadd (%p686_p6), %s114_s22, 4294966528  ;;  %v731_v0 = vld [vmem:[%s117_s23 + $0x8] sm:$0xff]  ;;  %v733_v1 = vld [vmem:[%s117_s23] sm:$0xff]  ;;  %s634_s24 = smov 127   ;;  %s635_s25 = smov 112   ;;  %v143_v6 = vlaneseq  ;;  %v636_v36 = vmov 0.0  }
  0x2b   : > { %230 = vrot.lane.b32.xlu1 %v731_v0, %s634_s24  ;;  %224 = vrot.lane.b32.xlu0 %v733_v1, %s634_s24  ;;  %v738_v2 = vld [vmem:[%s117_s23 + $0x18] sm:$0xff]  ;;  %v740_v3 = vld [vmem:[%s117_s23 + $0x10] sm:$0xff]  ;;  %v323_v9 = vrot.slane %v731_v0, 1  ;;  %v322_v13 = vrot.slane %v733_v1, 1  ;;  %s475_s16 = sshll.u32 %s723_s20, 1  ;;  %s477_s26 = sshll.u32 %s668_s10, 1 }
  0x2c   : > { %273 = vrot.lane.b32.xlu2 %v733_v1, %s635_s25  ;;  %v747_v4 = vld [vmem:[%s117_s23 + $0x20] sm:$0xff]  ;;  %v750_v5 = vld [vmem:[%s117_s23 + $0x28] sm:$0xff]  ;;  %v147_v7 = vshrl.u32 %v143_v6, 7  ;;  %v325_v10 = vrot.slane %v738_v2, 1  ;;  %v324_v14 = vrot.slane %v740_v3, 1  ;;  %v778_v39 = vand.u32 127, %v143_v6  ;;  %s395_s29 = scalar_lea.hbm %s863_s1, %s477_s26 }
  0x2d   : > { %v327_v11 = vrot.slane %v750_v5, 1  ;;  %v326_v15 = vrot.slane %v747_v4, 1  ;;  %s136_s30 = scalar_lea.vmem [#allocation5], %s475_s16  ;;  %s399_s3 = sshll.u32 %s395_s29, 4  ;;  %vm376_vm9 = vcmask 1040384   ;;  %vm381_vm10 = vcmp.lt.s32.totalorder %v143_v6, 256  ;;  %s400_s3 = int_to_ptr.hbm [resolvable:$true] %s399_s3 }
  0x2e   : > { %vm328_vm0 = vcmp.lt.s32.totalorder %v147_v7, 7  ;;  %v148_v12 = vadd.s32 8, %v147_v7  ;;  %v149_v18 = vadd.s32 16, %v147_v7  ;;  %v186_v19 = vand.u32 7, %v147_v7  ;;  %s397_s2 = sshll.u32 %s136_s30, 4  ;;  %s385_s10 = scalar_lea.sflag [#allocation4], %s723_s20  ;;  %s398_s2 = int_to_ptr.vmem [resolvable:$true] %s397_s2 }
  0x2f   : > { %v330_v16 = vsel %vm328_vm0, %v325_v10, %v327_v11  ;;  %v332_v17 = vsel %vm328_vm0, %v323_v9, %v325_v10  ;;  %v331_v23 = vsel %vm328_vm0, %v322_v13, %v324_v14  ;;  %v329_v26 = vsel %vm328_vm0, %v324_v14, %v326_v15  ;;  %s578_s4 = sshra.s32 %s400_s3, 4  ;;  %s584_s14 = scalar_lea.hbm %s863_s1, 4  ;;  %s579_s4 = int_to_ptr.hbm [resolvable:$true] %s578_s4 }
  0x30   : > { %v193_v20 = vand.u32 7, %v148_v12  ;;  %v336_v24 = vsub.f32 %v731_v0, %v332_v17  ;;  %v338_v25 = vsub.f32 %v738_v2, %v330_v16  ;;  %v334_v27 = vsel %vm328_vm0, %v327_v11, %v323_v9  ;;  %s580_s5 = scalar_lea.hbm %s579_s4, 2  ;;  %p585_p3 = scmp.lt.s32.totalorder %s579_s4, %s863_s1 }
  0x31   : > { %v200_v29 = vand.u32 7, %v149_v18  ;;  %vm218_vm1 = vcmp.ne.s32.totalorder %v186_v19, 7  ;;  %v333_v30 = vsel %vm328_vm0, %v326_v15, %v322_v13  ;;  %v335_v31 = vsub.f32 %v733_v1, %v331_v23  ;;  %p581_p6 = scmp.ne.s32.totalorder %s579_s4, %s580_s5  ;;  %p586_p4 = scmp.lt.s32.totalorder %s584_s14, %s580_s5 }
  0x32   : > { %vm219_vm2 = vcmp.ne.s32.totalorder %v193_v20, 7  ;;  %v337_v32 = vsub.f32 %v740_v3, %v329_v26  ;;  %v340_v33 = vsub.f32 %v750_v5, %v334_v27  ;;  %v342_v34 = vmul.f32 %v336_v24, %v336_v24 }
  0x33   : > { %232 = vrot.lane.b32.xlu1 %v738_v2, %s634_s24  ;;  %226 = vrot.lane.b32.xlu0 %v740_v3, %s634_s24  ;;  %v344_v35 = vmul.f32 %v338_v25, %v338_v25  ;;  %v221_v37 = vsel %vm218_vm1, 3.1001986e-05, %v636_v36  ;;  %v222_v38 = vsel %vm219_vm2, 3.1001986e-05, %v636_v36  ;;  %vm220_vm3 = vcmp.ne.s32.totalorder %v200_v29, 7  ;;  %p582_p13 = pnand %p581_p6, %p693_p11  ;;  %p587_p5 = por %p586_p4, %p585_p3 }
  0x34   : > { %275 = vrot.lane.b32.xlu2 %v740_v3, %s635_s25  ;;  %v339_v40 = vsub.f32 %v747_v4, %v333_v30  ;;  %v341_v41 = vmul.f32 %v335_v31, %v335_v31  ;;  %v343_v44 = vmul.f32 %v337_v32, %v337_v32  ;;  %v346_v45 = vmul.f32 %v340_v33, %v340_v33 }
  0x35   : > { %v348_v46 = vmul.f32 %v342_v34, %v221_v37  ;;  %v350_v47 = vmul.f32 %v344_v35, %v222_v38  ;;  %v223_v48 = vsel %vm220_vm3, 3.1001986e-05, %v636_v36  ;;  %vm236_vm4 = vcmp.lt.s32.totalorder %v778_v39, 127  ;;  %p583_p2 = pneg %p582_p13 }
  0x36   : > { %v345_v49 = vmul.f32 %v339_v40, %v339_v40  ;;  %v347_v51 = vmul.f32 %v341_v41, %v221_v37  ;;  %v349_v52 = vmul.f32 %v343_v44, %v222_v38  ;;  %v352_v53 = vmul.f32 %v346_v45, %v223_v48 }
  0x37   : > { %v361_v54 = vadd.f32 %v350_v47, %v348_v46  ;;  %vm285_vm5 = vcmp.lt.s32.totalorder %v778_v39, 112  ;;  %p588_p7 = pnand %p587_p5, %p583_p2 }
  0x38   : > { %v351_v61 = vmul.f32 %v345_v49, %v223_v48  ;;  %v353_v62 = vadd.f32 %v349_v52, %v347_v51  ;;  %v145_v48 = vadd.s32 128, %v778_v39 }
  0x39   : > { %v362_v63 = vadd.f32 %v361_v54, %v352_v53 }
  0x3a   : > { %v354_v20 = vadd.f32 %v353_v62, %v351_v61  ;;  %vm179_vm6 = vcmp.lt.s32.totalorder %v145_v48, 240 }
  0x3b   : > { %281 = vrot.lane.b32.xlu1 %v738_v2, %s635_s25  ;;  %279 = vrot.lane.b32.xlu0 %v731_v0, %s635_s25 }
  0x3c   : > { %228 = vrot.lane.b32.xlu2 %v747_v4, %s634_s24  ;;  %v355_v30 = vrot.slane %v354_v20, 4 }
  0x3e   : > { %v356_v49 = vadd.f32 %v355_v30, %v354_v20 }
  0x43   : > { %277 = vrot.lane.b32.xlu1 %v747_v4, %s635_s25  ;;  %234 = vrot.lane.b32.xlu0 %v750_v5, %s634_s24 }
  0x44   : > { %283 = vrot.lane.b32.xlu2 %v750_v5, %s635_s25 }
  0x86   : > { %v756_v8 = vpop.permute.xlu2 %273 }
  0x8e   : > { %v276_v28 = vpop.permute.xlu2 %275 }
  0x96   : > { %v229_v50 = vpop.permute.xlu2 %228 }
  0x9d   : > { %v231_v21 = vpop.permute.xlu1 %230  ;;  %v225_v22 = vpop.permute.xlu0 %224 }
  0x9e   : > { %v237_v55 = vsel %vm236_vm4, %v225_v22, %v231_v21  ;;  %v240_v58 = vsel %vm236_vm4, %v231_v21, %v225_v22  ;;  %v363_v21 = vrot.slane %v362_v63, 4  ;;  %v284_v23 = vpop.permute.xlu2 %283 }
  0x9f   : > { %v243_v18 = vsub.f32 %v733_v1, %v237_v55  ;;  %v244_v19 = vsub.f32 %v731_v0, %v240_v58  ;;  %v161_v58 = vand.u32 15, %v145_v48 }
  0xa0   : > { %v364_v31 = vadd.f32 %v363_v21, %v362_v63 }
  0xa1   : > { %vm175_vm8 = vcmp.ne.s32.totalorder %v161_v58, 15 }
  0xa2   : > { %v365_v54 = vrot.slane %v364_v31, 2 }
  0xa5   : > { %v233_v42 = vpop.permute.xlu1 %232  ;;  %v227_v43 = vpop.permute.xlu0 %226 }
  0xa6   : > { %v238_v56 = vsel %vm236_vm4, %v227_v43, %v233_v42  ;;  %v241_v57 = vsel %vm236_vm4, %v233_v42, %v227_v43 }
  0xa7   : > { %v245_v12 = vsub.f32 %v740_v3, %v238_v56  ;;  %v246_v13 = vsub.f32 %v738_v2, %v241_v57  ;;  %v154_v57 = vand.u32 15, %v778_v39 }
  0xa9   : > { %v251_v22 = vmul.f32 %v245_v12, %v245_v12  ;;  %vm174_vm7 = vcmp.ne.s32.totalorder %v154_v57, 15 }
  0xad   : > { %v282_v59 = vpop.permute.xlu1 %281  ;;  %v280_v60 = vpop.permute.xlu0 %279 }
  0xae   : > { %v287_v7 = vsel %vm285_vm5, %v276_v28, %v282_v59  ;;  %v290_v9 = vsel %vm285_vm5, %v282_v59, %v276_v28  ;;  %v286_v10 = vsel %vm285_vm5, %v756_v8, %v280_v60  ;;  %v289_v11 = vsel %vm285_vm5, %v280_v60, %v756_v8 }
  0xaf   : > { %v294_v14 = vsub.f32 %v740_v3, %v287_v7  ;;  %v295_v15 = vsub.f32 %v738_v2, %v290_v9  ;;  %v292_v16 = vsub.f32 %v733_v1, %v286_v10  ;;  %v293_v17 = vsub.f32 %v731_v0, %v289_v11 }
  0xb0   : > { %v252_v8 = vmul.f32 %v246_v13, %v246_v13  ;;  %v249_v3 = vmul.f32 %v243_v18, %v243_v18  ;;  %v250_v28 = vmul.f32 %v244_v19, %v244_v19  ;;  %v357_v59 = vrot.slane %v356_v49, 2 }
  0xb1   : > { %v300_v24 = vmul.f32 %v294_v14, %v294_v14  ;;  %v301_v25 = vmul.f32 %v295_v15, %v295_v15  ;;  %v298_v26 = vmul.f32 %v292_v16, %v292_v16  ;;  %v299_v27 = vmul.f32 %v293_v17, %v293_v17 }
  0xb2   : > { %v255_v40 = vadd.f32 %v251_v22, %v249_v3  ;;  %v263_v41 = vadd.f32 %v252_v8, %v250_v28  ;;  %v366_v7 = vadd.f32 %v365_v54, %v364_v31  ;;  %v358_v13 = vadd.f32 %v357_v59, %v356_v49 }
  0xb3   : > { %v304_v42 = vadd.f32 %v300_v24, %v298_v26  ;;  %v312_v43 = vadd.f32 %v301_v25, %v299_v27  ;;  %v181_v17 = vsel %vm179_vm6, 2.8935185e-05, %v636_v36  ;;  %v176_v8 = vsel %vm174_vm7, 2.8935185e-05, %v636_v36 }
  0xb4   : > { %v367_v18 = vrot.slane %v366_v7, 1  ;;  %v359_v24 = vrot.slane %v358_v13, 1 }
  0xb5   : > { %v278_v2 = vpop.permute.xlu1 %277  ;;  %v235_v29 = vpop.permute.xlu0 %234 }
  0xb6   : > { %v288_v1 = vsel %vm285_vm5, %v278_v2, %v284_v23  ;;  %v291_v0 = vsel %vm285_vm5, %v284_v23, %v278_v2  ;;  %v239_v32 = vsel %vm236_vm4, %v229_v50, %v235_v29  ;;  %v242_v33 = vsel %vm236_vm4, %v235_v29, %v229_v50 }
  0xb7   : > { %v296_v34 = vsub.f32 %v747_v4, %v288_v1  ;;  %v297_v35 = vsub.f32 %v750_v5, %v291_v0  ;;  %v247_v37 = vsub.f32 %v747_v4, %v239_v32  ;;  %v248_v38 = vsub.f32 %v750_v5, %v242_v33 }
  0xb8   : > { %v177_v23 = vsel %vm175_vm8, 2.8935185e-05, %v636_v36  ;;  %v368_v28 = vadd.f32 %v367_v18, %v366_v7  ;;  %v360_v36 = vadd.f32 %v359_v24, %v358_v13 }
  0xb9   : > { %v302_v44 = vmul.f32 %v296_v34, %v296_v34  ;;  %v303_v45 = vmul.f32 %v297_v35, %v297_v35  ;;  %v253_v46 = vmul.f32 %v247_v37, %v247_v37  ;;  %v254_v47 = vmul.f32 %v248_v38, %v248_v38 }
  0xbb   : > { %v305_v50 = vadd.f32 %v304_v42, %v302_v44  ;;  %v313_v51 = vadd.f32 %v312_v43, %v303_v45  ;;  %v256_v52 = vadd.f32 %v255_v40, %v253_v46  ;;  %v264_v53 = vadd.f32 %v263_v41, %v254_v47 }
  0xbd   : > { %v306_v55 = vrot.slane %v305_v50, 4  ;;  %v314_v4 = vrot.slane %v313_v51, 4  ;;  %v257_v56 = vrot.slane %v256_v52, 4  ;;  %v265_v5 = vrot.slane %v264_v53, 4 }
  0xbf   : > { %v307_v60 = vadd.f32 %v306_v55, %v305_v50  ;;  %v315_v61 = vadd.f32 %v314_v4, %v313_v51  ;;  %v258_v62 = vadd.f32 %v257_v56, %v256_v52  ;;  %v266_v63 = vadd.f32 %v265_v5, %v264_v53 }
  0xc1   : > { %v308_v9 = vrot.slane %v307_v60, 2  ;;  %v316_v10 = vrot.slane %v315_v61, 2  ;;  %v259_v11 = vrot.slane %v258_v62, 2  ;;  %v267_v12 = vrot.slane %v266_v63, 2 }
  0xc3   : > { %v309_v14 = vadd.f32 %v308_v9, %v307_v60  ;;  %v317_v15 = vadd.f32 %v316_v10, %v315_v61  ;;  %v260_v16 = vadd.f32 %v259_v11, %v258_v62  ;;  %v268_v39 = vadd.f32 %v267_v12, %v266_v63 }
  0xc5   : > { %v310_v19 = vrot.slane %v309_v14, 1  ;;  %v318_v20 = vrot.slane %v317_v15, 1  ;;  %v261_v21 = vrot.slane %v260_v16, 1  ;;  %v269_v22 = vrot.slane %v268_v39, 1 }
  0xc7   : > { %v311_v25 = vadd.f32 %v310_v19, %v309_v14  ;;  %v319_v26 = vadd.f32 %v318_v20, %v317_v15  ;;  %v262_v27 = vadd.f32 %v261_v21, %v260_v16  ;;  %v270_v3 = vadd.f32 %v269_v22, %v268_v39 }
  0xc9   : > { %v320_v2 = vmul.f32 2.8935185e-05, %v311_v25  ;;  %v321_v29 = vmul.f32 %v319_v26, %v181_v17  ;;  %v271_v30 = vmul.f32 %v262_v27, %v176_v8  ;;  %v272_v31 = vmul.f32 %v270_v3, %v177_v23 }
  0xcb   : > { %v369_v1 = vadd.f32 %v320_v2, %v271_v30  ;;  %v370_v0 = vadd.f32 %v321_v29, %v272_v31 }
  0xcd   : > { %v372_v32 = vadd.f32 %v370_v0, %v368_v28  ;;  %v371_v33 = vadd.f32 %v369_v1, %v360_v36 }
  0xcf   : > { %v375_v34 = vrot.slane %v372_v32, 7 }
  0xd1   : > { %v377_v35 = vsel %vm376_vm9, %v371_v33, %v375_v34 }
  0xd2   : > { %383 = vst.msk [vmem:[%s136_s30] sm:$0x3] %vm381_vm10, %v377_v35 }
  0xd3   : > { %591 = shalt.err (!%p588_p7)
}
  0xd4   : > { %485 = dma.vmem_to_hbm [thread:$0]  (%p693_p11), %s398_s2, 32, %s400_s3, %s385_s10  }
  0xd5 PF: > { %s411_s20 = sand.u32 1, %s618_s6   ;;  %p492_p8 = pnand %p472_p9, %p697_p12 }
  0xd6   : > { %s412_s22 = scalar_lea.sflag [#allocation4], %s411_s20 }
  0xd7   : > { %p493_p10 = pneg %p492_p8 }
  0xd9   : > { %613 = dma.done.wait (%p493_p10), %s412_s22, 32  }
  0xda   : > { %615 = vsyncadd (%p493_p10), %s412_s22, 4294967264  ;;  %p14_p0 = scmp.ge.s32.totalorder %s672_s12, 4   ;;  %s868_s6 = smov %s622_s7 }
  0xdb   : > { %s869_s7 = smov %s626_s8  ;;  %s870_s8 = smov %s684_s15 }
  0xdc   : > { %s871_s9 = smov %s672_s12  ;;  %16 = sbr.rel (!%p14_p0) target bundleno = 5 (0x5), region = 69 }
  0xe1   :  { %418 = vsyncpa [#allocation3], 1 }
  0xe2   :  { %420 = vsyncpa [#allocation3 + $0x1], 1 }
  0xe3   :  { %421 = vsyncpa [#allocation4], 1 }
  0xe4   :  { %423 = vsyncpa [#allocation4 + $0x1], 1 }

</bundles_post_ra>
